<compile_context>
chip_gen: v7x
topology: tpu7x:2x2x1
jax: 0.10.0
libtpu: 0.0.40
codegen_flags: <defaults>
</compile_context>

<pallas_src>
import functools

import jax
import jax.numpy as jnp
from jax.experimental import pallas as pl
from jax.experimental.pallas import tpu as pltpu


def mlp_argmax_kernel(x_ref, w1_ref, b1_ref, w2_ref, b2_ref,
                      pred_ref, idx_ref, *, out_dim):
    # embeds: Linear(vocab_size -> hidden_dim)
    h = jnp.dot(x_ref[...], w1_ref[...], preferred_element_type=jnp.float32)
    # encoder: ReLU (bias add + ReLU in f32 -- matches PyTorch numerics)
    h = jnp.maximum(h + b1_ref[...], 0.0)
    # out: Linear(hidden_dim -> out_dim)
    p = jnp.dot(h, w2_ref[...], preferred_element_type=jnp.float32) + b2_ref[...]
    pred_ref[...] = p.astype(pred_ref.dtype)

    # Fused argmax over the single row (B == 1).
    # torch.max(prediction, 0) returns the first index of the maximum; the
    # min-over-matching-indices below reproduces that tie-break.
    col = jax.lax.broadcasted_iota(jnp.int32, p.shape, dimension=1)
    row_max = jnp.max(p)  # full reduce to scalar (single valid row)
    idx = jnp.min(jnp.where(p == row_max, col, out_dim))
    # Scalar SMEM store: no lane broadcast, no VMEM row, no post-kernel slice
    # of a 128-wide buffer.
    idx_ref[0, 0] = idx.astype(jnp.int32)


@jax.jit
def model_forward(x, w1, b1, w2, b2):
    """Fused forward of the PyTorch module.

    Returns (prediction, idx) as DEVICE arrays:
      prediction : squeezed logits, shape [out_dim], float32
      idx        : scalar int32 argmax (first-max tie-break, like torch.max)
    The caller converts idx to a Python int (the `.item()` of the original
    module) only when needed, keeping the hot path free of host syncs.
    """
    B = x.shape[0]
    out_dim = w2.shape[1]
    # Forward semantics (prediction.squeeze(); idx.item()) imply one example.
    assert B == 1, "model_forward expects a single example (B == 1)"

    pred, idx = pl.pallas_call(
        functools.partial(mlp_argmax_kernel, out_dim=out_dim),
        out_shape=(
            jax.ShapeDtypeStruct((B, out_dim), jnp.float32),
            jax.ShapeDtypeStruct((1, 1), jnp.int32),
        ),
        # Whole-array blocks, no grid: everything fits VMEM comfortably on
        # v5e / v6e / v7x; a grid would only add per-step overhead.
        in_specs=[
            pl.BlockSpec(memory_space=pltpu.MemorySpace.VMEM),  # x
            pl.BlockSpec(memory_space=pltpu.MemorySpace.VMEM),  # w1
            pl.BlockSpec(memory_space=pltpu.MemorySpace.VMEM),  # b1
            pl.BlockSpec(memory_space=pltpu.MemorySpace.VMEM),  # w2
            pl.BlockSpec(memory_space=pltpu.MemorySpace.VMEM),  # b2
        ],
        out_specs=(
            pl.BlockSpec(memory_space=pltpu.MemorySpace.VMEM),  # logits [B, out_dim]
            pl.BlockSpec(memory_space=pltpu.MemorySpace.SMEM),  # argmax scalar
        ),
    )(x, w1, b1, w2, b2)

    prediction = pred[0]       # .squeeze() -> [out_dim]
    return prediction, idx[0, 0]


if __name__ == "__main__":
    vocab_size = 32
    hidden_dim = 64
    out_dim = 2
    B = 1  # forward semantics (idx.item()) imply a single example

    key = jax.random.PRNGKey(0)
    k_x, k_w1, k_b1, k_w2, k_b2 = jax.random.split(key, 5)

    # Deterministic synthetic parameters (nn.Linear weights, transposed).
    x = jax.random.normal(k_x, (B, vocab_size), dtype=jnp.float32)
    w1 = jax.random.normal(k_w1, (vocab_size, hidden_dim), dtype=jnp.float32) * 0.1
    b1 = jax.random.normal(k_b1, (1, hidden_dim), dtype=jnp.float32) * 0.1
    w2 = jax.random.normal(k_w2, (hidden_dim, out_dim), dtype=jnp.float32) * 0.1
    b2 = jax.random.normal(k_b2, (1, out_dim), dtype=jnp.float32) * 0.1

    prediction, idx = model_forward(x, w1, b1, w2, b2)
    jax.block_until_ready((prediction, idx))

    # Pure-JAX reference check.
    ref = (jnp.maximum(x @ w1 + b1, 0.0) @ w2 + b2).reshape(-1)
    assert prediction.shape == (out_dim,), prediction.shape
    assert jnp.allclose(prediction, ref, atol=1e-5), (prediction, ref)
    assert int(idx) == int(jnp.argmax(ref)), (int(idx), int(jnp.argmax(ref)))

    # TODO(synk): nn.CrossEntropyLoss (compute_loss) is training-only and not
    # part of forward(); it is intentionally not implemented as a kernel.
    print("KERNEL_OK")
</pallas_src>

<mosaic_0001>
module attributes {stable_mosaic.version = 11 : i64} {
  func.func @mlp_argmax_kernel(%arg0: memref<1x32xf32, #tpu.memory_space<vmem>>, %arg1: memref<32x64xf32, #tpu.memory_space<vmem>>, %arg2: memref<1x64xf32, #tpu.memory_space<vmem>>, %arg3: memref<64x2xf32, #tpu.memory_space<vmem>>, %arg4: memref<1x2xf32, #tpu.memory_space<vmem>>, %arg5: memref<1x2xf32, #tpu.memory_space<vmem>>, %arg6: memref<1x1xi32, #tpu.memory_space<smem>>) attributes {dimension_semantics = [], scalar_prefetch = 0 : i64, scratch_operands = 0 : i64, tpu.core_type = #tpu.core_type<tc>} {
    %c0 = arith.constant 0 : index
    %c0_0 = arith.constant 0 : index
    %0 = vector.load %arg0[%c0, %c0_0] : memref<1x32xf32, #tpu.memory_space<vmem>>, vector<1x32xf32>
    %c0_1 = arith.constant 0 : index
    %c0_2 = arith.constant 0 : index
    %1 = vector.load %arg1[%c0_1, %c0_2] : memref<32x64xf32, #tpu.memory_space<vmem>>, vector<32x64xf32>
    %cst = arith.constant dense<0.000000e+00> : vector<1x64xf32>
    %2 = tpu.matmul %0, %1, %cst {dimension_numbers = #tpu.dot_dimension_numbers<[1], [0], [0], [1], [0, 0, 1, 1], [], []>} : vector<1x32xf32>, vector<32x64xf32>, vector<1x64xf32> -> vector<1x64xf32>
    %c0_3 = arith.constant 0 : index
    %c0_4 = arith.constant 0 : index
    %3 = vector.load %arg2[%c0_3, %c0_4] : memref<1x64xf32, #tpu.memory_space<vmem>>, vector<1x64xf32>
    %4 = arith.addf %2, %3 : vector<1x64xf32>
    %cst_5 = arith.constant 0.000000e+00 : f32
    %5 = vector.broadcast %cst_5 : f32 to vector<1x64xf32>
    %6 = arith.maximumf %4, %5 : vector<1x64xf32>
    %c0_6 = arith.constant 0 : index
    %c0_7 = arith.constant 0 : index
    %7 = vector.load %arg3[%c0_6, %c0_7] : memref<64x2xf32, #tpu.memory_space<vmem>>, vector<64x2xf32>
    %cst_8 = arith.constant dense<0.000000e+00> : vector<1x2xf32>
    %8 = tpu.matmul %6, %7, %cst_8 {dimension_numbers = #tpu.dot_dimension_numbers<[1], [0], [0], [1], [0, 0, 1, 1], [], []>} : vector<1x64xf32>, vector<64x2xf32>, vector<1x2xf32> -> vector<1x2xf32>
    %c0_9 = arith.constant 0 : index
    %c0_10 = arith.constant 0 : index
    %9 = vector.load %arg4[%c0_9, %c0_10] : memref<1x2xf32, #tpu.memory_space<vmem>>, vector<1x2xf32>
    %10 = arith.addf %8, %9 : vector<1x2xf32>
    %c0_11 = arith.constant 0 : index
    %c0_12 = arith.constant 0 : index
    %11 = vector.load %arg5[%c0_11, %c0_12] : memref<1x2xf32, #tpu.memory_space<vmem>>, vector<1x2xf32>
    tpu.vector_store %arg5[%c0_11, %c0_12], %10 {strides = array<i32>} : memref<1x2xf32, #tpu.memory_space<vmem>>, vector<1x2xf32>,
    %12 = tpu.iota {dimensions = array<i32: 1>} : vector<1x2xi32>
    %13 = vector.shape_cast %10 : vector<1x2xf32> to vector<1x1x2xf32>
    %cst_13 = arith.constant dense<0xFF800000> : vector<1xf32>
    %14 = vector.multi_reduction <maximumf>, %13, %cst_13 [1, 2] : vector<1x1x2xf32> to vector<1xf32>
    %15 = vector.shape_cast %14 : vector<1xf32> to vector<1x1x1xf32>
    %16 = vector.extract %15[0, 0, 0] : f32 from vector<1x1x1xf32>
    %17 = vector.broadcast %16 : f32 to vector<1x2xf32>
    %18 = arith.cmpf oeq, %10, %17 : vector<1x2xf32>
    %c2_i32 = arith.constant 2 : i32
    %19 = vector.broadcast %c2_i32 : i32 to vector<1x2xi32>
    %20 = arith.select %18, %12, %19 : vector<1x2xi1>, vector<1x2xi32>
    %21 = vector.shape_cast %20 : vector<1x2xi32> to vector<1x1x2xi32>
    %cst_14 = arith.constant dense<2147483647> : vector<1xi32>
    %22 = vector.multi_reduction <minsi>, %21, %cst_14 [1, 2] : vector<1x1x2xi32> to vector<1xi32>
    %23 = vector.shape_cast %22 : vector<1xi32> to vector<1x1x1xi32>
    %24 = vector.extract %23[0, 0, 0] : i32 from vector<1x1x1xi32>
    %c0_15 = arith.constant 0 : index
    %c0_16 = arith.constant 0 : index
    %25 = memref.load %arg6[%c0_15, %c0_16] : memref<1x1xi32, #tpu.memory_space<smem>>
    memref.store %24, %arg6[%c0_15, %c0_16] : memref<1x1xi32, #tpu.memory_space<smem>>
    return
  }
}

</mosaic_0001>

<bundles_post_ra>
// kernel: model_forward.1
= control target key start
LH: loop header
LB: loop body
LE: loop exit
PB: predicated region body
PF: predicated region fallthrough
CT: control target
= control target key end

     0   :  { %12 = vsyncpa [#allocation3], 0  ;;  %v368_v3 = vmov 0.0|0.0   ;;  %vm369_vm0 = vmmov 0   ;;  %v370_v6 = vmov 0.0   ;;  %s480_s0 = inlined_call_operand.vmem [shape: f32[1,32], index: 0, kind: input, shape index: {}]   ;;  %s481_s1 = inlined_call_operand.vmem [shape: f32[32,64], index: 1, kind: input, shape index: {}]   ;;  %s482_s2 = inlined_call_operand.vmem [shape: f32[1,64], index: 2, kind: input, shape index: {}]   ;;  %s483_s3 = inlined_call_operand.vmem [shape: f32[64,2], index: 3, kind: input, shape index: {}]   ;;  %s484_s4 = inlined_call_operand.vmem [shape: f32[1,2], index: 4, kind: input, shape index: {}]   ;;  %s485_s5 = inlined_call_operand.hbm [shape: f32[1,2], index: 5, kind: output, shape index: {0}]   ;;  %s486_s6 = inlined_call_operand.hbm [shape: s32[1,1], index: 6, kind: output, shape index: {1}]  }
   0x1   :  { %v25_v0 = vld [vmem:[%s481_s1] sm:$0xff]  ;;  %v26_v1 = vld [vmem:[%s481_s1 + $0x8] sm:$0xff]  ;;  %v27_v2 = vld [vmem:[%s481_s1 + $0x10] sm:$0xff]  ;;  %305 = vmatprep.subr.bf16.mxu0 %v368_v3  ;;  %283 = vmatprep.mubr.msk.f32.mxu0 %vm369_vm0, %v370_v6 }
   0x2   :  { %v306_v4 = vpack.c.bf16 %v26_v1, %v25_v0  ;;  %v28_v5 = vld [vmem:[%s481_s1 + $0x18] sm:$0xff]  ;;  %v105_v7 = vld [vmem:[%s483_s3] sm:$0xff]  ;;  %311 = vmatprep.subr.bf16.mxu1 %v368_v3  ;;  %v106_v8 = vld [vmem:[%s483_s3 + $0x8] sm:$0xff]  ;;  %302 = vmatprep.mubr.msk.f32.mxu1 %vm369_vm0, %v370_v6 }
   0x3   :  { %v107_v9 = vld [vmem:[%s483_s3 + $0x10] sm:$0xff]  ;;  %v108_v10 = vld [vmem:[%s483_s3 + $0x18] sm:$0xff]  ;;  %v309_v11 = vpack.c.bf16 %v28_v5, %v27_v2  ;;  %v312_v12 = vpack.c.bf16 %v106_v8, %v105_v7 }
   0x4   :  { %307 = vmatpush3.bf16.msra.mxu0 %v306_v4 }
   0x5   :  { %308 = vmatprep.subr.bf16.mxu0 %v368_v3 }
   0x6   :  { %13 = vsyncpa [#allocation4], 0  ;;  %313 = vmatpush3.bf16.msra.mxu1 %v312_v12  ;;  %v315_v13 = vpack.c.bf16 %v108_v10, %v107_v9  ;;  %v109_v14 = vld [vmem:[%s483_s3 + $0x20] sm:$0xff]  ;;  %v110_v15 = vld [vmem:[%s483_s3 + $0x28] sm:$0xff]  ;;  %vm30_vm1 = vcmask 261120   ;;  %vm114_vm2 = vcmask 523264   ;;  %v190_v38 = vlaneseq }
   0x7   :  { %314 = vmatprep.subr.bf16.mxu1 %v368_v3  ;;  %v24_v16 = vld [vmem:[%s480_s0] sm:$0x1]  ;;  %v318_v17 = vpack.c.bf16 %v110_v15, %v109_v14  ;;  %v111_v18 = vld [vmem:[%s483_s3 + $0x30] sm:$0xff]  ;;  %v112_v19 = vld [vmem:[%s483_s3 + $0x38] sm:$0xff]  ;;  %vm188_vm3 = vcmask 8192   ;;  %s371_s3 = smov [#allocation2]  }
   0x8   :  { %310 = vmatpush3.bf16.msra.mxu0 %v309_v11  ;;  %v321_v20 = vpack.c.bf16 %v112_v19, %v111_v18  ;;  %v29_v21 = vld [vmem:[%s482_s2] sm:$0x1]  ;;  %v191_v39 = vand.u32 127, %v190_v38 }
   0x9   :  { %v113_v26 = vld [vmem:[%s484_s4] sm:$0x1]  ;;  %s238_s4 = sshll.u32 %s371_s3, 4  ;;  %s239_s4 = int_to_ptr.vmem [resolvable:$true] %s238_s4 }
   0xa   :  { %316 = vmatpush3.bf16.msra.mxu1 %v315_v13  ;;  %s332_s25 = scalar_lea.vmem %s239_s4, 16  ;;  %s336_s26 = scalar_lea.vmem %s239_s4, 32 }
   0xb   :  { %284 = vmatmul.mubr.msk.f32.vlgmr.msra.gmra.mrb[0].mxu0 %vm30_vm1, %v24_v16  ;;  %317 = vmatprep.subr.bf16.mxu1 %v368_v3  ;;  %p333_p0 = scmp.ne.s32.totalorder %s239_s4, %s332_s25  ;;  %p337_p1 = scmp.lt.s32.totalorder %s239_s4, %s239_s4 }
   0xc   :  { %p338_p2 = scmp.lt.s32.totalorder %s336_s26, %s332_s25 }
   0xe   :  { %319 = vmatpush3.bf16.msra.mxu1 %v318_v17  ;;  %p339_p3 = por %p338_p2, %p337_p1 }
   0xf   :  { %320 = vmatprep.subr.bf16.mxu1 %v368_v3 }
  0x10   :  { %p340_p4 = pnand %p339_p3, %p333_p0 }
  0x12   :  { %322 = vmatpush3.bf16.msra.mxu1 %v321_v20 }
  0xde   :  { %v100_v22 = vpop.f32.mrb[0].mxu0 }
  0xdf   :  { %v101_v23 = vadd.f32 %v100_v22, %v29_v21  ;;  %v285_v24 = vpop.f32.mrb[1].mxu0 }
  0xe1   :  { %v104_v25 = vmax.f32 %v101_v23, 0.0 }
  0xe3   :  { %303 = vmatmul.mubr.msk.f32.vlgmr.msra.gmra.mrb[0].mxu1 %vm114_vm2, %v104_v25 }
 0x1b6   :  { %v184_v27 = vpop.f32.mrb[0].mxu1 }
 0x1b7   :  { %v185_v28 = vadd.f32 %v184_v27, %v113_v26  ;;  %v304_v29 = vpop.f32.mrb[1].mxu1 }
 0x1b9   :  { %v192_v30 = vsel %vm188_vm3, %v185_v28, -inf  ;;  %189 = vst.msk [vmem:[#allocation2] sm:$0x1] %vm188_vm3, %v185_v28 }
 0x1ba   :  { %193 = vmax.xlane.f32.xlu0 %v192_v30 }
 0x247   :  { %v194_v31 = vpop.xlane.xlu0 %193 }
 0x248   :  { %v195_v32 = vrot.slane %v194_v31, 4 }
 0x24a   :  { %v196_v33 = vmax.f32 %v194_v31, %v195_v32 }
 0x24c   :  { %v197_v34 = vrot.slane %v196_v33, 2 }
 0x24e   :  { %v198_v35 = vmax.f32 %v196_v33, %v197_v34 }
 0x250   :  { %v199_v36 = vrot.slane %v198_v35, 1 }
 0x252   :  { %v200_v37 = vmax.f32 %v198_v35, %v199_v36 }
 0x254   :  { %323 = vpush %v200_v37 }
 0x285   :  { %s324_s2 = spop %323 }
 0x286   :  { %v202_v40 = vstv %s324_s2 }
 0x287   :  { %vm203_vm4 = vcmp.eq.f32.partialorder %v185_v28, %v202_v40 }
 0x288   :  { %v204_v41 = vsel %vm203_vm4, %v191_v39, 2 }
 0x289   :  { %v205_v42 = vsel %vm188_vm3, %v204_v41, 2147483647 }
 0x28a   :  { %v207_v43 = vshra.s32 %v205_v42, 16  ;;  %v206_v45 = vand.u32 65535, %v205_v42 }
 0x28c   :  { %v209_v44 = vcvt.s32.f32 %v207_v43  ;;  %v208_v47 = vcvt.s32.f32 %v206_v45 }
 0x28e   :  { %210 = vmin.xlane.f32.xlu0 %v209_v44 }
 0x31b   :  { %v211_v46 = vpop.xlane.xlu0 %210 }
 0x31c   :  { %vm212_vm5 = vcmp.eq.f32.partialorder %v209_v44, %v211_v46 }
 0x31d   :  { %v213_v48 = vsel %vm212_vm5, %v208_v47, inf }
 0x31e   :  { %214 = vmin.xlane.f32.xlu1 %v213_v48 }
 0x31f   :  { %343 = shalt.err (!%p340_p4)
}
 0x320   :  { %s344_s29 = scalar_lea.hbm %s485_s5, 16 }
 0x321   :  { %p345_p5 = scmp.ne.s32.totalorder %s485_s5, %s344_s29  ;;  %p348_p6 = scmp.lt.u32.totalorder %s344_s29, %s485_s5 }
 0x323   :  { %p350_p7 = pnand %p348_p6, %p345_p5 }
 0x325   :  { %353 = shalt.err (!%p350_p7)
}
 0x326   :  { %241 = dma.vmem_to_hbm [thread:$0]  %s239_s4, 16, %s485_s5, [#allocation3]   ;;  %v217_v49 = vcvt.f32.s32 %v211_v46 }
 0x327   :  { %s354_s5 = scalar_lea.hbm %s486_s6, 16 }
 0x328   :  { %v218_v51 = vshll.u32 %v217_v49, 16  ;;  %p355_p8 = scmp.ne.s32.totalorder %s486_s6, %s354_s5  ;;  %p358_p9 = scmp.lt.u32.totalorder %s354_s5, %s486_s6 }
 0x32a   :  { %p360_p10 = pnand %p358_p9, %p355_p8 }
 0x3ab   :  { %v215_v50 = vpop.xlane.xlu1 %214 }
 0x3ac   :  { %v216_v52 = vcvt.f32.s32 %v215_v50 }
 0x3ae   :  { %v219_v53 = vadd.s32 %v218_v51, %v216_v52 }
 0x3b0   :  { %v220_v54 = vrot.slane %v219_v53, 4 }
 0x3b2   :  { %vm221_vm6 = vcmp.lt.s32.totalorder %v219_v53, %v220_v54 }
 0x3b3   :  { %v222_v55 = vsel %vm221_vm6, %v219_v53, %v220_v54 }
 0x3b4   :  { %v223_v56 = vrot.slane %v222_v55, 2 }
 0x3b6   :  { %vm224_vm7 = vcmp.lt.s32.totalorder %v222_v55, %v223_v56 }
 0x3b7   :  { %v225_v57 = vsel %vm224_vm7, %v222_v55, %v223_v56 }
 0x3b8   :  { %v226_v58 = vrot.slane %v225_v57, 1 }
 0x3ba   :  { %vm227_vm8 = vcmp.lt.s32.totalorder %v225_v57, %v226_v58 }
 0x3bb   :  { %v228_v59 = vsel %vm227_vm8, %v225_v57, %v226_v58 }
 0x3bc   :  { %325 = vpush %v228_v59 }
 0x3ed   :  { %s326_s12 = spop %325 }
 0x3ee   :  { %231 = sst [smem:[#allocation5]] %s326_s12 }
 0x3ef   :  { %363 = shalt.err (!%p360_p10)
}
 0x3f0   :  { %s372_s18 = smov [#allocation5]  }
 0x3f1   :  { %249 = dma.smem_to_hbm %s372_s18, 16, %s486_s6, [#allocation4]  }
 0x3f2   :  { %364 = dma.done.wait [#allocation3], 16  }
 0x3f3   :  { %365 = vsyncadd [#allocation3], 4294967280 }
 0x3f4   :  { %366 = dma.done.wait [#allocation4], 16  }
 0x3f5   :  { %367 = vsyncadd [#allocation4], 4294967280 }
 0x3f6   :  { %256 = sfence }
 0x3f7   :  { %257 = vsyncpa [#allocation3], 1 }
 0x3f8   :  { %258 = vsyncpa [#allocation4], 1 }

</bundles_post_ra>
